<compile_context>
chip_gen: v5e
topology: v5e:2x2
jax: 0.10.0
libtpu: 0.0.40
codegen_flags: <defaults>
</compile_context>

<pallas_src>
import math
from functools import lru_cache

import jax
import jax.numpy as jnp
from jax import lax
from jax.experimental import pallas as pl
from jax.experimental.pallas import tpu as pltpu

_PAIRWISE_MAX_D = 32            # exact O(D^2) pairwise path up to this D


# --------------------------------------------------------------------------- #
# Hardware-aware tiling policy
# --------------------------------------------------------------------------- #
@lru_cache(maxsize=None)
def _tpu_vmem_and_cores():
    """(per-core VMEM bytes, TensorCores per chip); conservative fallback."""
    cap, cores = None, 1
    try:
        info = pltpu.get_tpu_info()
        cap = getattr(info, "vmem_capacity_bytes", None)
        for name in ("num_cores", "core_count", "num_tensorcores",
                     "tensorcores_per_chip"):
            v = getattr(info, name, None)
            if v:
                cores = int(v)
                break
    except Exception:
        pass
    if not cap or int(cap) <= 0:
        cap = 64 * 1024 * 1024          # size for v7x's per-core 64 MiB VMEM
    return int(cap), int(cores)


def _vmem_policy():
    """(block budget, requested scoped limit, physical capacity, cores)."""
    cap, cores = _tpu_vmem_and_cores()
    budget = min(cap * 3 // 8, 56 * 1024 * 1024)   # 48 MiB on v5e/v6e, 24 MiB on v7x
    limit = min(cap * 3 // 4, 110 * 1024 * 1024)   # 96 MiB on v5e/v6e, 48 MiB on v7x
    return budget, limit, cap, cores


def _per_column_bytes(d, itemsize, pairwise):
    """Estimated live VMEM bytes per (P, Q) column inside one block:
    double-buffered in + out tiles, f32 temporaries, and (pairwise only)
    the (Dj, Di) difference slab."""
    b = 4 * d * itemsize + 6 * d * 4
    if pairwise:
        b += 2 * d * d * 4
    return b


def _newton_iters(d):
    # The active set typically shrinks geometrically, so O(log D) Newton
    # steps converge; the +4 margin plus the final exact refinement gives
    # ample slack for random-ish data while staying ~3x cheaper than the
    # old 32-pass bisection.
    return min(24, max(10, int(math.ceil(math.log2(max(d, 2)))) + 4))


# --------------------------------------------------------------------------- #
# Kernels (factories closed over the static reduce axis)
# --------------------------------------------------------------------------- #
def _make_pairwise_kernel(axis):
    """Exact sort-free sparsemax for small D.

    Single-accumulator support test: t_i = sum_j relu(z_j - z_i); element i is
    in the support iff t_i < 1 (identical to the sorted-cumsum test)."""
    def kernel(x_ref, o_ref):
        x = x_ref[...].astype(jnp.float32)
        z = x - jnp.max(x, axis=axis, keepdims=True)
        zj = jnp.expand_dims(z, axis + 1)       # reduced (j) copy of the D axis
        zi = jnp.expand_dims(z, axis)           # kept    (i) copy of the D axis
        t = jnp.sum(jnp.maximum(zj - zi, 0.0), axis=axis)
        support = t < 1.0
        k = jnp.sum(jnp.where(support, 1.0, 0.0), axis=axis, keepdims=True)
        s = jnp.sum(jnp.where(support, z, 0.0), axis=axis, keepdims=True)
        tau = (s - 1.0) / k                     # k >= 1 always (max elem has t = 0)
        o_ref[...] = jnp.maximum(z - tau, 0.0).astype(o_ref.dtype)
    return kernel


def _make_newton_kernel(axis, d, iters):
    """Large-D path: piecewise-linear Newton on tau + exact refinement.

    f(tau) = sum relu(z - tau) - 1 is convex, decreasing, piecewise linear;
    tau0 = (sum(z) - 1)/D is a lower bound on the root, and the update
    tau <- (sum_{z>tau} z - 1)/#{z>tau} increases monotonically, landing on
    tau* exactly once the support stabilises."""
    inv_d = 1.0 / d

    def kernel(x_ref, o_ref):
        x = x_ref[...].astype(jnp.float32)
        z = x - jnp.max(x, axis=axis, keepdims=True)
        tau = (jnp.sum(z, axis=axis, keepdims=True) - 1.0) * inv_d

        def newton(_, tau):
            sup = z > tau
            k = jnp.maximum(
                jnp.sum(jnp.where(sup, 1.0, 0.0), axis=axis, keepdims=True), 1.0)
            s = jnp.sum(jnp.where(sup, z, 0.0), axis=axis, keepdims=True)
            return (s - 1.0) / k

        tau = lax.fori_loop(0, iters, newton, tau, unroll=True)
        # Final exact support / tau refinement (one more Newton step).
        sup = z > tau
        k = jnp.maximum(
            jnp.sum(jnp.where(sup, 1.0, 0.0), axis=axis, keepdims=True), 1.0)
        s = jnp.sum(jnp.where(sup, z, 0.0), axis=axis, keepdims=True)
        tau = (s - 1.0) / k
        o_ref[...] = jnp.maximum(z - tau, 0.0).astype(o_ref.dtype)
    return kernel


# --------------------------------------------------------------------------- #
# Wrapper
# --------------------------------------------------------------------------- #
def sparsemax_pallas(x, dim=0):
    """Forward of Sparsemax(dim) using a Pallas TPU kernel."""
    if x.ndim == 0:
        raise ValueError("sparsemax needs at least one dimension")
    orig_shape = x.shape
    orig_dtype = x.dtype
    dim = dim % x.ndim

    d = int(orig_shape[dim])
    p = int(math.prod(orig_shape[:dim]))
    q = int(math.prod(orig_shape[dim + 1:]))
    if d == 0 or p == 0 or q == 0:
        return jnp.zeros(orig_shape, orig_dtype)

    pairwise = d <= _PAIRWISE_MAX_D
    itemsize = jnp.dtype(orig_dtype).itemsize
    budget, limit, cap, cores = _vmem_policy()
    multi_core = cores >= 2
    per_col = _per_column_bytes(d, itemsize, pairwise)

    # The minimal lane-dense block must fit the per-generation VMEM limit.
    min_cols = 8 if q == 1 else (q if q < 128 else 128)
    min_block = per_col * min_cols
    if min_block > limit:
        limit = min(cap * 9 // 10, min_block + (1 << 20))
    if min_block > limit:
        # TODO(synk): add a D-tiled two-pass Pallas path (grid axis over D with
        # scratch max/tau accumulators, then an elementwise write pass) for
        # very large D; falling back to the sort-based JAX path for now.
        return sparsemax_ref(x, dim).astype(orig_dtype)
    budget = max(min(budget, limit), min_block)

    iters = _newton_iters(d)
    flops_elt = (3 * d + 8) if pairwise else (5 * (iters + 1) + 6)
    cost = pl.CostEstimate(
        flops=int(p * q * d * flops_elt),
        transcendentals=0,
        bytes_accessed=int(2 * p * q * d * itemsize),
    )
    kernel = (_make_pairwise_kernel(1) if pairwise
              else _make_newton_kernel(1, d, iters))

    if q == 1:
        # ---- dim is the trailing axis: keep D on the lane axis (no HBM
        # transpose round trip); reductions use the idle XLU cross-lane slot.
        max_rows = max(8, (budget // per_col) // 8 * 8)
        pp = pl.cdiv(p, 8) * 8
        br = min(pp, max_rows)
        if multi_core and pp >= 16 and pp // br < 2:
            br = max(8, (pp // 2) // 8 * 8)      # let the 2 TCs split the grid
        pp = pl.cdiv(p, br) * br
        x2 = x.reshape(p, d)
        if pp != p:
            x2 = jnp.pad(x2, ((0, pp - p), (0, 0)))
        out2 = pl.pallas_call(
            kernel,
            out_shape=jax.ShapeDtypeStruct((pp, d), orig_dtype),
            grid=(pp // br,),
            in_specs=[pl.BlockSpec((br, d), lambda i: (i, 0))],
            out_specs=pl.BlockSpec((br, d), lambda i: (i, 0)),
            compiler_params=pltpu.CompilerParams(
                dimension_semantics=("parallel",),
                vmem_limit_bytes=int(limit)),
            cost_estimate=cost,
        )(x2)
        return out2[:p].reshape(orig_shape)

    # ---- general case: (P, D, Q) with D in the middle and the trailing axes
    # flattened onto the lane axis (pure reshape, lane-dense output).
    max_cols = max(min_cols, budget // per_col)
    tq = q if q <= max_cols else max(128, (max_cols // 128) * 128)
    qp = pl.cdiv(q, tq) * tq
    grid_q = qp // tq
    bp = max(1, min(p, max_cols // max(tq, 1)))
    if multi_core and p >= 2 and grid_q < 2:
        bp = min(bp, max(1, p // 2))             # leave >= 2 grid steps for 2 TCs
    pp = pl.cdiv(p, bp) * bp
    x3 = x.reshape(p, d, q)
    if (pp, qp) != (p, q):
        # Padded rows/columns are independent problems; sliced off below.
        x3 = jnp.pad(x3, ((0, pp - p), (0, 0), (0, qp - q)))
    out3 = pl.pallas_call(
        kernel,
        out_shape=jax.ShapeDtypeStruct((pp, d, qp), orig_dtype),
        grid=(pp // bp, grid_q),
        in_specs=[pl.BlockSpec((bp, d, tq), lambda i, j: (i, 0, j))],
        out_specs=pl.BlockSpec((bp, d, tq), lambda i, j: (i, 0, j)),
        compiler_params=pltpu.CompilerParams(
            dimension_semantics=("parallel", "parallel"),
            vmem_limit_bytes=int(limit)),
        cost_estimate=cost,
    )(x3)
    return out3[:p, :, :q].reshape(orig_shape)


def sparsemax_ref(x, dim=0):
    """Pure-JAX reference (direct port of the sorting-based torch code)."""
    xm = jnp.moveaxis(x.astype(jnp.float32), dim, -1)
    z = xm - jnp.max(xm, axis=-1, keepdims=True)
    z_srt = -jnp.sort(-z, axis=-1)
    cs = jnp.cumsum(z_srt, axis=-1) - 1.0
    d = z.shape[-1]
    rho = jnp.arange(1, d + 1, dtype=z.dtype)
    support = rho * z_srt > cs
    k = jnp.sum(support.astype(jnp.int32), axis=-1, keepdims=True)
    tau = jnp.take_along_axis(cs, k - 1, axis=-1) / k.astype(z.dtype)
    out = jnp.maximum(z - tau, 0.0)
    return jnp.moveaxis(out, -1, dim).astype(x.dtype)


class Sparsemax:
    """Mirror of the PyTorch nn.Module (forward only; no parameters)."""

    def __init__(self, dim=0):
        self.dim = dim

    def __call__(self, x):
        return sparsemax_pallas(x, dim=self.dim)


if __name__ == "__main__":
    key = jax.random.PRNGKey(0)
    k1, k2, k3, k4 = jax.random.split(key, 4)

    # Case 1: NCHW-like input, sparsemax over channels (mid layout, pairwise).
    x1 = jax.random.normal(k1, (2, 4, 16, 16), dtype=jnp.float32)
    y1 = jax.block_until_ready(Sparsemax(dim=1)(x1))
    r1 = sparsemax_ref(x1, dim=1)

    # Case 2: (seq, hidden) input with the module's default dim=0 (mid layout).
    x2 = jax.random.normal(k2, (8, 32), dtype=jnp.float32)
    y2 = jax.block_until_ready(Sparsemax(dim=0)(x2))
    r2 = sparsemax_ref(x2, dim=0)

    # Case 3: large last axis (lane layout, Newton path, no HBM transpose).
    x3 = jax.random.normal(k3, (4, 160), dtype=jnp.float32)
    y3 = jax.block_until_ready(Sparsemax(dim=1)(x3))
    r3 = sparsemax_ref(x3, dim=1)

    # Case 4: small last axis (lane layout, pairwise path).
    x4 = jax.random.normal(k4, (16, 24), dtype=jnp.float32)
    y4 = jax.block_until_ready(Sparsemax(dim=1)(x4))
    r4 = sparsemax_ref(x4, dim=1)

    assert y1.shape == x1.shape and y2.shape == x2.shape
    assert y3.shape == x3.shape and y4.shape == x4.shape
    assert jnp.allclose(y1, r1, atol=1e-5, rtol=1e-5)
    assert jnp.allclose(y2, r2, atol=1e-5, rtol=1e-5)
    assert jnp.allclose(y3, r3, atol=1e-5, rtol=1e-5)
    assert jnp.allclose(y4, r4, atol=1e-5, rtol=1e-5)
    # sparsemax outputs are non-negative and sum to 1 along `dim`
    assert jnp.all(y1 >= 0) and jnp.allclose(jnp.sum(y1, axis=1), 1.0, atol=1e-5)
    assert jnp.all(y2 >= 0) and jnp.allclose(jnp.sum(y2, axis=0), 1.0, atol=1e-5)
    assert jnp.all(y3 >= 0) and jnp.allclose(jnp.sum(y3, axis=1), 1.0, atol=1e-5)
    assert jnp.all(y4 >= 0) and jnp.allclose(jnp.sum(y4, axis=1), 1.0, atol=1e-5)

    print("KERNEL_OK")
</pallas_src>

<mosaic_0001>
module attributes {stable_mosaic.version = 11 : i64} {
  func.func @kernel(%arg0: i32, %arg1: i32, %arg2: memref<2x4x256xf32, #tpu.memory_space<vmem>>, %arg3: memref<2x4x256xf32, #tpu.memory_space<vmem>>) attributes {dimension_semantics = [#tpu.dimension_semantics<parallel>, #tpu.dimension_semantics<parallel>], iteration_bounds = array<i64: 1, 1>, scalar_prefetch = 0 : i64, scratch_operands = 0 : i64, tpu.core_type = #tpu.core_type<tc>, window_params = [{transform_indices = @transform_0, window_bounds = array<i64: 2, 4, 256>}, {transform_indices = @transform_1, window_bounds = array<i64: 2, 4, 256>}]} {
    %c0 = arith.constant 0 : index
    %c0_0 = arith.constant 0 : index
    %c0_1 = arith.constant 0 : index
    %0 = vector.load %arg2[%c0, %c0_0, %c0_1] : memref<2x4x256xf32, #tpu.memory_space<vmem>>, vector<2x4x256xf32>
    %cst = arith.constant dense<0xFF800000> : vector<2x256xf32>
    %1 = vector.multi_reduction <maximumf>, %0, %cst [1] : vector<2x4x256xf32> to vector<2x256xf32>
    %2 = vector.shape_cast %1 : vector<2x256xf32> to vector<2x1x256xf32>
    %3 = vector.broadcast %2 : vector<2x1x256xf32> to vector<2x4x256xf32>
    %4 = arith.subf %0, %3 : vector<2x4x256xf32>
    %5 = vector.shape_cast %4 : vector<2x4x256xf32> to vector<2x4x1x256xf32>
    %6 = vector.shape_cast %4 : vector<2x4x256xf32> to vector<2x1x4x256xf32>
    %7 = vector.broadcast %5 : vector<2x4x1x256xf32> to vector<2x4x4x256xf32>
    %8 = vector.broadcast %6 : vector<2x1x4x256xf32> to vector<2x4x4x256xf32>
    %9 = arith.subf %7, %8 : vector<2x4x4x256xf32>
    %cst_2 = arith.constant 0.000000e+00 : f32
    %10 = vector.broadcast %cst_2 : f32 to vector<2x4x4x256xf32>
    %11 = arith.maximumf %9, %10 : vector<2x4x4x256xf32>
    %cst_3 = arith.constant dense<0.000000e+00> : vector<2x4x256xf32>
    %12 = vector.multi_reduction <add>, %11, %cst_3 [1] : vector<2x4x4x256xf32> to vector<2x4x256xf32>
    %cst_4 = arith.constant 1.000000e+00 : f32
    %13 = vector.broadcast %cst_4 : f32 to vector<2x4x256xf32>
    %14 = arith.cmpf olt, %12, %13 : vector<2x4x256xf32>
    %cst_5 = arith.constant 1.000000e+00 : f32
    %cst_6 = arith.constant 0.000000e+00 : f32
    %15 = vector.broadcast %cst_5 : f32 to vector<2x4x256xf32>
    %16 = vector.broadcast %cst_6 : f32 to vector<2x4x256xf32>
    %17 = arith.select %14, %15, %16 : vector<2x4x256xi1>, vector<2x4x256xf32>
    %cst_7 = arith.constant dense<0.000000e+00> : vector<2x256xf32>
    %18 = vector.multi_reduction <add>, %17, %cst_7 [1] : vector<2x4x256xf32> to vector<2x256xf32>
    %19 = vector.shape_cast %18 : vector<2x256xf32> to vector<2x1x256xf32>
    %cst_8 = arith.constant 0.000000e+00 : f32
    %20 = vector.broadcast %cst_8 : f32 to vector<2x4x256xf32>
    %21 = arith.select %14, %4, %20 : vector<2x4x256xi1>, vector<2x4x256xf32>
    %cst_9 = arith.constant dense<0.000000e+00> : vector<2x256xf32>
    %22 = vector.multi_reduction <add>, %21, %cst_9 [1] : vector<2x4x256xf32> to vector<2x256xf32>
    %23 = vector.shape_cast %22 : vector<2x256xf32> to vector<2x1x256xf32>
    %cst_10 = arith.constant 1.000000e+00 : f32
    %24 = vector.broadcast %cst_10 : f32 to vector<2x1x256xf32>
    %25 = arith.subf %23, %24 : vector<2x1x256xf32>
    %26 = arith.divf %25, %19 : vector<2x1x256xf32>
    %27 = vector.broadcast %26 : vector<2x1x256xf32> to vector<2x4x256xf32>
    %28 = arith.subf %4, %27 : vector<2x4x256xf32>
    %cst_11 = arith.constant 0.000000e+00 : f32
    %29 = vector.broadcast %cst_11 : f32 to vector<2x4x256xf32>
    %30 = arith.maximumf %28, %29 : vector<2x4x256xf32>
    %c0_12 = arith.constant 0 : index
    %c0_13 = arith.constant 0 : index
    %c0_14 = arith.constant 0 : index
    %31 = vector.load %arg3[%c0_12, %c0_13, %c0_14] : memref<2x4x256xf32, #tpu.memory_space<vmem>>, vector<2x4x256xf32>
    tpu.vector_store %arg3[%c0_12, %c0_13, %c0_14], %30 {strides = array<i32>} : memref<2x4x256xf32, #tpu.memory_space<vmem>>, vector<2x4x256xf32>,
    return
  }
  func.func @transform_0(%arg0: i32, %arg1: i32) -> (i32, i32, i32) {
    %c0_i32 = arith.constant 0 : i32
    %c0_i32_0 = arith.constant 0 : i32
    return %arg0, %c0_i32, %arg1 : i32, i32, i32
  }
  func.func @transform_1(%arg0: i32, %arg1: i32) -> (i32, i32, i32) {
    %c0_i32 = arith.constant 0 : i32
    %c0_i32_0 = arith.constant 0 : i32
    return %arg0, %c0_i32, %arg1 : i32, i32, i32
  }
}

</mosaic_0001>

<bundles_post_ra>
// kernel: tpu_custom_call.1
= control target key start
LH: loop header
LB: loop body
LE: loop exit
PB: predicated region body
PF: predicated region fallthrough
CT: control target
= control target key end

     0   :  { %6 = vsyncpa [#allocation3], 0  ;;  %s613_s0 = inlined_call_operand.hbm [shape: f32[2,4,256], index: 0, kind: input, shape index: {}]   ;;  %s614_s1 = inlined_call_operand.hbm [shape: f32[2,4,256], index: 1, kind: output, shape index: {}]  }
   0x1   :  { %7 = vsyncpa [#allocation4], 0  ;;  %s12_s8 = sshll.u32 %s613_s0, 4  ;;  %s485_s9 = smov [#allocation2]   ;;  %s13_s8 = int_to_ptr.hbm [resolvable:$true] %s12_s8 }
   0x2   :  { %s14_s10 = sshll.u32 %s485_s9, 4  ;;  %s486_s11 = smov 128   ;;  %s15_s10 = int_to_ptr.vmem [resolvable:$true] %s14_s10 }
   0x3   :  { %s487_s12 = smov 8  }
   0x4   :  { %20 = dma.hbm_to_vmem [thread:$0]  %s13_s8, 256, %s15_s10, [#allocation3], %s486_s11, %s486_s11, %s487_s12  }
   0x5   :  { %481 = dma.done.wait [#allocation3], 256  }
   0x6   :  { %482 = vsyncadd [#allocation3], 4294967040  ;;  %v25_v0 = vld [vmem:[#allocation2] sm:$0xff]  ;;  %v26_v1 = vld [vmem:[#allocation2 + $0x8] sm:$0xff]  ;;  %vm40_vm0 = vcmask 1043456   ;;  %vm85_vm1 = vcmask 1040384  }
   0x7   :  { %29 = vst [vmem:[#allocation1] ss:$2 sm:$0xff] %v25_v0  ;;  %vm87_vm2 = vcmask 1041409   ;;  %vm90_vm3 = vcmask 1042434   ;;  %vm93_vm4 = vcmask 1043459   ;;  %s489_s0 = smov [#allocation5]  }
   0x8   :  { %33 = vst [vmem:[#allocation1 + $0x10] ss:$2 sm:$0xff] %v26_v1  ;;  %s401_s13 = sshll.u32 %s489_s0, 4  ;;  %s403_s16 = sshll.u32 %s614_s1, 4  ;;  %s402_s13 = int_to_ptr.vmem [resolvable:$true] %s401_s13  ;;  %s404_s16 = int_to_ptr.hbm [resolvable:$true] %s403_s16 }
   0xe   :  { %v30_v2 = vld.sshfl [vmem:[#allocation1] sm:$0xff pattern:$0x75316420]  ;;  %v31_v3 = vld.sshfl [vmem:[#allocation1 + $0x8] sm:$0xff pattern:$0x75316420] }
   0xf   :  { %v41_v4 = vsel %vm40_vm0, %v30_v2, -inf  ;;  %v48_v5 = vsel %vm40_vm0, %v31_v3, -inf  ;;  %v34_v6 = vld.sshfl [vmem:[#allocation1 + $0x10] sm:$0xff pattern:$0x75316420] }
  0x10   :  { %v42_v7 = vrot.slane %v41_v4, 4  ;;  %v49_v8 = vrot.slane %v48_v5, 4  ;;  %v35_v9 = vld.sshfl [vmem:[#allocation1 + $0x18] sm:$0xff pattern:$0x75316420]  ;;  %v55_v10 = vsel %vm40_vm0, %v34_v6, -inf }
  0x11   :  { %v56_v11 = vrot.slane %v55_v10, 4  ;;  %v62_v12 = vsel %vm40_vm0, %v35_v9, -inf }
  0x12   :  { %v43_v13 = vmax.f32 %v41_v4, %v42_v7  ;;  %v50_v14 = vmax.f32 %v48_v5, %v49_v8  ;;  %v63_v15 = vrot.slane %v62_v12, 4 }
  0x13   :  { %v57_v16 = vmax.f32 %v55_v10, %v56_v11 }
  0x14   :  { %v44_v17 = vrot.slane %v43_v13, 2  ;;  %v51_v18 = vrot.slane %v50_v14, 2  ;;  %v64_v19 = vmax.f32 %v62_v12, %v63_v15 }
  0x15   :  { %v58_v20 = vrot.slane %v57_v16, 2 }
  0x16   :  { %v45_v21 = vmax.f32 %v43_v13, %v44_v17  ;;  %v52_v22 = vmax.f32 %v50_v14, %v51_v18  ;;  %v65_v23 = vrot.slane %v64_v19, 2 }
  0x17   :  { %v59_v24 = vmax.f32 %v57_v16, %v58_v20 }
  0x18   :  { %v46_v25 = vrot.slane %v45_v21, 1  ;;  %v53_v26 = vrot.slane %v52_v22, 1  ;;  %v66_v27 = vmax.f32 %v64_v19, %v65_v23 }
  0x19   :  { %v60_v28 = vrot.slane %v59_v24, 1 }
  0x1a   :  { %v54_v29 = vmax.f32 %v52_v22, %v53_v26  ;;  %v67_v30 = vrot.slane %v66_v27, 1  ;;  %v47_v31 = vmax.f32 %v45_v21, %v46_v25 }
  0x1b   :  { %v61_v33 = vmax.f32 %v59_v24, %v60_v28 }
  0x1c   :  { %v73_v32 = vrot.slane %v54_v29, 4  ;;  %v68_v34 = vmax.f32 %v66_v27, %v67_v30 }
  0x1e   :  { %v75_v35 = vsel %vm40_vm0, %v47_v31, %v73_v32  ;;  %v74_v36 = vrot.slane %v68_v34, 4 }
  0x1f   :  { %v511_v37 = vsub.f32 %v25_v0, %v75_v35 }
  0x20   :  { %v76_v38 = vsel %vm40_vm0, %v61_v33, %v74_v36 }
  0x21   :  { %135 = vst [vmem:[#allocation1] ss:$2 sm:$0xff] %v511_v37  ;;  %v515_v39 = vsub.f32 %v26_v1, %v76_v38  ;;  %v83_v40 = vrot.slane %v511_v37, 3 }
  0x22   :  { %143 = vst [vmem:[#allocation1 + $0x20] ss:$2 sm:$0xff] %v511_v37 }
  0x23   :  { %147 = vst [vmem:[#allocation1 + $0x30] ss:$2 sm:$0xff] %v511_v37  ;;  %v84_v41 = vrot.slane %v515_v39, 3  ;;  %v86_v42 = vsel %vm85_vm1, %v511_v37, %v83_v40  ;;  %v88_v43 = vsel %vm87_vm2, %v511_v37, %v83_v40  ;;  %v91_v44 = vsel %vm90_vm3, %v511_v37, %v83_v40 }
  0x24   :  { %139 = vst [vmem:[#allocation1 + $0x10] ss:$2 sm:$0xff] %v511_v37  ;;  %v89_v45 = vrot.slane %v88_v43, 1  ;;  %v92_v46 = vrot.slane %v91_v44, 2  ;;  %v103_v48 = vperm.slane %v86_v42, 0  ;;  %v104_v51 = vperm.slane %v86_v42, 1 }
  0x25   :  { %v530_v47 = vsel %vm85_vm1, %v515_v39, %v84_v41  ;;  %v534_v49 = vsel %vm87_vm2, %v515_v39, %v84_v41  ;;  %v99_v50 = vsel %vm90_vm3, %v515_v39, %v84_v41  ;;  %v94_v61 = vsel %vm93_vm4, %v511_v37, %v83_v40 }
  0x26   :  { %v111_v52 = vperm.slane %v530_v47, 0  ;;  %v112_v53 = vperm.slane %v530_v47, 1  ;;  %v98_v54 = vrot.slane %v534_v49, 1  ;;  %v105_v55 = vperm.slane %v89_v45, 0 }
  0x27   :  { %v100_v56 = vrot.slane %v99_v50, 2  ;;  %v107_v57 = vperm.slane %v92_v46, 0  ;;  %v108_v58 = vperm.slane %v92_v46, 1  ;;  %v106_v0 = vperm.slane %v89_v45, 1 }
  0x28   :  { %v136_v59 = vld.sshfl [vmem:[#allocation1] sm:$0xff pattern:$0x75316420]  ;;  %v137_v60 = vld.sshfl [vmem:[#allocation1 + $0x8] sm:$0xff pattern:$0x75316420]  ;;  %v101_v4 = vsel %vm93_vm4, %v515_v39, %v84_v41 }
  0x29   :  { %150 = vst [vmem:[#allocation1] ss:$2 sm:$0xff] %v515_v39  ;;  %v178_v62 = vsub.f32 %v103_v48, %v136_v59  ;;  %v179_v63 = vsub.f32 %v104_v51, %v137_v60  ;;  %v115_v1 = vperm.slane %v100_v56, 0  ;;  %v144_v2 = vld.sshfl [vmem:[#allocation1 + $0x20] sm:$0xff pattern:$0x75316420] }
  0x2a   :  { %v145_v3 = vld.sshfl [vmem:[#allocation1 + $0x28] sm:$0xff pattern:$0x75316420]  ;;  %v182_v8 = vsub.f32 %v107_v57, %v144_v2  ;;  %v95_v12 = vrot.slane %v94_v61, 3  ;;  %v116_v14 = vperm.slane %v100_v56, 1  ;;  %v102_v19 = vrot.slane %v101_v4, 3 }
  0x2b   :  { %v194_v5 = vmax.f32 %v178_v62, 0.0  ;;  %v195_v6 = vmax.f32 %v179_v63, 0.0  ;;  %v140_v7 = vld.sshfl [vmem:[#allocation1 + $0x10] sm:$0xff pattern:$0x75316420]  ;;  %v183_v9 = vsub.f32 %v108_v58, %v145_v3  ;;  %v113_v38 = vperm.slane %v98_v54, 0 }
  0x2c   :  { %v141_v10 = vld.sshfl [vmem:[#allocation1 + $0x18] sm:$0xff pattern:$0x75316420]  ;;  %v180_v11 = vsub.f32 %v105_v55, %v140_v7  ;;  %156 = vst [vmem:[#allocation1 + $0x20] ss:$2 sm:$0xff] %v515_v39  ;;  %v198_v15 = vmax.f32 %v182_v8, 0.0 }
  0x2d   :  { %153 = vst [vmem:[#allocation1 + $0x10] ss:$2 sm:$0xff] %v515_v39  ;;  %v181_v13 = vsub.f32 %v106_v0, %v141_v10  ;;  %v199_v16 = vmax.f32 %v183_v9, 0.0  ;;  %v210_v18 = vsel %vm40_vm0, %v194_v5, 0.0  ;;  %v109_v20 = vperm.slane %v95_v12, 0 }
  0x2e   :  { %v196_v17 = vmax.f32 %v180_v11, 0.0  ;;  %v213_v22 = vsel %vm40_vm0, %v198_v15, 0.0  ;;  %v217_v23 = vsel %vm40_vm0, %v195_v6, 0.0  ;;  %v110_v24 = vperm.slane %v95_v12, 1 }
  0x2f   :  { %v197_v21 = vmax.f32 %v181_v13, 0.0  ;;  %v220_v26 = vsel %vm40_vm0, %v199_v16, 0.0  ;;  %v117_v27 = vperm.slane %v102_v19, 0  ;;  %v148_v28 = vld.sshfl [vmem:[#allocation1 + $0x30] sm:$0xff pattern:$0x75316420] }
  0x30   :  { %v211_v25 = vsel %vm40_vm0, %v196_v17, 0.0  ;;  %v118_v31 = vperm.slane %v102_v19, 1  ;;  %v149_v32 = vld.sshfl [vmem:[#allocation1 + $0x38] sm:$0xff pattern:$0x75316420]  ;;  %v184_v33 = vsub.f32 %v109_v20, %v148_v28  ;;  %v114_v57 = vperm.slane %v98_v54, 1 }
  0x31   :  { %v212_v29 = vadd.f32 %v211_v25, %v210_v18  ;;  %v218_v30 = vsel %vm40_vm0, %v197_v21, 0.0  ;;  %159 = vst [vmem:[#allocation1 + $0x30] ss:$2 sm:$0xff] %v515_v39  ;;  %v185_v35 = vsub.f32 %v110_v24, %v149_v32  ;;  %v151_v36 = vld.sshfl [vmem:[#allocation1] sm:$0xff pattern:$0x75316420] }
  0x32   :  { %v219_v34 = vadd.f32 %v218_v30, %v217_v23  ;;  %v186_v43 = vsub.f32 %v111_v52, %v151_v36  ;;  %v200_v48 = vmax.f32 %v184_v33, 0.0  ;;  %v152_v50 = vld.sshfl [vmem:[#allocation1 + $0x8] sm:$0xff pattern:$0x75316420]  ;;  %v488_v6 = vmov 0.0  }
  0x33   :  { %v157_v40 = vld.sshfl [vmem:[#allocation1 + $0x20] sm:$0xff pattern:$0x75316420]  ;;  %v158_v41 = vld.sshfl [vmem:[#allocation1 + $0x28] sm:$0xff pattern:$0x75316420]  ;;  %v214_v42 = vadd.f32 %v213_v22, %v212_v29  ;;  %v187_v55 = vsub.f32 %v112_v53, %v152_v50 }
  0x34   :  { %v190_v44 = vsub.f32 %v115_v1, %v157_v40  ;;  %v191_v45 = vsub.f32 %v116_v14, %v158_v41  ;;  %v221_v46 = vadd.f32 %v220_v26, %v219_v34  ;;  %v201_v51 = vmax.f32 %v185_v35, 0.0  ;;  %274 = vst [vmem:[#allocation1] ss:$2 sm:$0xff] %v511_v37  ;;  %v154_v52 = vld.sshfl [vmem:[#allocation1 + $0x10] sm:$0xff pattern:$0x75316420] }
  0x35   :  { %v202_v56 = vmax.f32 %v186_v43, 0.0  ;;  %v215_v60 = vsel %vm40_vm0, %v200_v48, 0.0  ;;  %v203_v63 = vmax.f32 %v187_v55, 0.0  ;;  %v155_v0 = vld.sshfl [vmem:[#allocation1 + $0x18] sm:$0xff pattern:$0x75316420]  ;;  %v188_v1 = vsub.f32 %v113_v38, %v154_v52 }
  0x36   :  { %v206_v58 = vmax.f32 %v190_v44, 0.0  ;;  %v207_v59 = vmax.f32 %v191_v45, 0.0  ;;  %v216_v61 = vadd.f32 %v215_v60, %v214_v42  ;;  %v222_v62 = vsel %vm40_vm0, %v201_v51, 0.0  ;;  %278 = vst [vmem:[#allocation1 + $0x10] ss:$2 sm:$0xff] %v515_v39 }
  0x37   :  { %v223_v2 = vadd.f32 %v222_v62, %v221_v46  ;;  %v189_v47 = vsub.f32 %v114_v57, %v155_v0  ;;  %v224_v53 = vsel %vm40_vm0, %v202_v56, 0.0  ;;  %v204_v9 = vmax.f32 %v188_v1, 0.0 }
  0x38   :  { %v227_v49 = vsel %vm40_vm0, %v206_v58, 0.0  ;;  %v160_v54 = vld.sshfl [vmem:[#allocation1 + $0x30] sm:$0xff pattern:$0x75316420]  ;;  %vm238_vm5 = vcmp.lt.f32.partialorder %v216_v61, 1.0  ;;  %v231_v23 = vsel %vm40_vm0, %v203_v63, 0.0 }
  0x39   :  { %v161_v3 = vld.sshfl [vmem:[#allocation1 + $0x38] sm:$0xff pattern:$0x75316420]  ;;  %v192_v4 = vsub.f32 %v117_v27, %v160_v54  ;;  %vm239_vm6 = vcmp.lt.f32.partialorder %v223_v2, 1.0  ;;  %v242_v7 = vsel %vm238_vm5, 1.0, %v488_v6  ;;  %v205_v10 = vmax.f32 %v189_v47, 0.0 }
  0x3a   :  { %v193_v5 = vsub.f32 %v118_v31, %v161_v3  ;;  %v243_v8 = vsel %vm239_vm6, 1.0, %v488_v6  ;;  %v246_v13 = vsel %vm40_vm0, %v242_v7, 0.0  ;;  %v225_v18 = vsel %vm40_vm0, %v204_v9, 0.0 }
  0x3b   :  { %v208_v11 = vmax.f32 %v192_v4, 0.0  ;;  %v253_v14 = vsel %vm40_vm0, %v243_v8, 0.0  ;;  %v247_v15 = vrot.slane %v246_v13, 4  ;;  %v275_v17 = vld.sshfl [vmem:[#allocation1] sm:$0xff pattern:$0x75316420]  ;;  %v226_v21 = vadd.f32 %v225_v18, %v224_v53 }
  0x3c   :  { %v209_v12 = vmax.f32 %v193_v5, 0.0  ;;  %v254_v16 = vrot.slane %v253_v14, 4  ;;  %v276_v19 = vld.sshfl [vmem:[#allocation1 + $0x8] sm:$0xff pattern:$0x75316420]  ;;  %v285_v20 = vsel %vm238_vm5, %v275_v17, 0.0 }
  0x3d   :  { %v229_v22 = vsel %vm40_vm0, %v208_v11, 0.0  ;;  %v248_v24 = vadd.f32 %v247_v15, %v246_v13  ;;  %v286_v26 = vsel %vm239_vm6, %v276_v19, 0.0  ;;  %v289_v27 = vsel %vm40_vm0, %v285_v20, 0.0  ;;  %v280_v61 = vld.sshfl [vmem:[#allocation1 + $0x18] sm:$0xff pattern:$0x75316420] }
  0x3e   :  { %v255_v25 = vadd.f32 %v254_v16, %v253_v14  ;;  %v290_v28 = vrot.slane %v289_v27, 4  ;;  %v296_v29 = vsel %vm40_vm0, %v286_v26, 0.0  ;;  %v228_v30 = vadd.f32 %v227_v49, %v226_v21  ;;  %v279_v47 = vld.sshfl [vmem:[#allocation1 + $0x10] sm:$0xff pattern:$0x75316420] }
  0x3f   :  { %v232_v31 = vsel %vm40_vm0, %v205_v10, 0.0  ;;  %v249_v32 = vrot.slane %v248_v24, 2  ;;  %v297_v34 = vrot.slane %v296_v29, 4  ;;  %v234_v38 = vsel %vm40_vm0, %v207_v59, 0.0 }
  0x40   :  { %v256_v33 = vrot.slane %v255_v25, 2  ;;  %v233_v35 = vadd.f32 %v232_v31, %v231_v23  ;;  %v230_v36 = vadd.f32 %v229_v22, %v228_v30  ;;  %v291_v44 = vadd.f32 %v290_v28, %v289_v27 }
  0x41   :  { %v250_v40 = vadd.f32 %v249_v32, %v248_v24  ;;  %v298_v42 = vadd.f32 %v297_v34, %v296_v29  ;;  %v236_v45 = vsel %vm40_vm0, %v209_v12, 0.0 }
  0x42   :  { %v257_v41 = vadd.f32 %v256_v33, %v255_v25  ;;  %v235_v43 = vadd.f32 %v234_v38, %v233_v35  ;;  %vm240_vm7 = vcmp.lt.f32.partialorder %v230_v36, 1.0  ;;  %v292_v58 = vrot.slane %v291_v44, 2 }
  0x43   :  { %v251_v46 = vrot.slane %v250_v40, 1  ;;  %v244_v51 = vsel %vm240_vm7, 1.0, %v488_v6  ;;  %v299_v57 = vrot.slane %v298_v42, 2  ;;  %v287_v49 = vsel %vm240_vm7, %v279_v47, 0.0 }
  0x44   :  { %v258_v48 = vrot.slane %v257_v41, 1  ;;  %v237_v50 = vadd.f32 %v236_v45, %v235_v43  ;;  %v260_v60 = vsel %vm40_vm0, %v244_v51, 0.0  ;;  %v293_v62 = vadd.f32 %v292_v58, %v291_v44 }
  0x45   :  { %v582_v55 = vadd.f32 %v251_v46, %v250_v40  ;;  %v300_v52 = vadd.f32 %v299_v57, %v298_v42  ;;  %v261_v63 = vrot.slane %v260_v60, 4  ;;  %v303_v13 = vsel %vm40_vm0, %v287_v49, 0.0 }
  0x46   :  { %v584_v56 = vadd.f32 %v258_v48, %v257_v41  ;;  %vm241_vm8 = vcmp.lt.f32.partialorder %v237_v50, 1.0  ;;  %v294_v7 = vrot.slane %v293_v62, 1  ;;  %v304_v24 = vrot.slane %v303_v13, 4 }
  0x47   :  { %425 = vrcp.f32 %v582_v55  ;;  %v245_v59 = vsel %vm241_vm8, 1.0, %v488_v6  ;;  %v288_v1 = vsel %vm241_vm8, %v280_v61, 0.0  ;;  %v262_v53 = vadd.f32 %v261_v63, %v260_v60 }
  0x48   :  { %427 = vrcp.f32 %v584_v56  ;;  %v267_v0 = vsel %vm40_vm0, %v245_v59, 0.0  ;;  %v301_v3 = vrot.slane %v300_v52, 1  ;;  %v310_v5 = vsel %vm40_vm0, %v288_v1, 0.0 }
  0x49   :  { %v268_v2 = vrot.slane %v267_v0, 4  ;;  %vm326_vm9 = vweird.f32 %v582_v55  ;;  %v263_v9 = vrot.slane %v262_v53, 2  ;;  %v330_v10 = vand.u32 2147483647, %v582_v55 }
  0x4a   :  { %v332_v15 = vand.u32 2147483648, %v582_v55  ;;  %v311_v17 = vrot.slane %v310_v5, 4  ;;  %v302_v18 = vadd.f32 %v301_v3, %v300_v52  ;;  %v347_v20 = vand.u32 2147483648, %v584_v56 }
  0x4b   :  { %v269_v4 = vadd.f32 %v268_v2, %v267_v0  ;;  %v264_v16 = vadd.f32 %v263_v9, %v262_v53  ;;  %v345_v26 = vand.u32 2147483647, %v584_v56  ;;  %v295_v28 = vadd.f32 %v294_v7, %v293_v62 }
  0x4c   :  { %v312_v31 = vadd.f32 %v311_v17, %v310_v5  ;;  %v333_v32 = vor.u32 1.1754944e-38, %v332_v15  ;;  %vm341_vm13 = vweird.f32 %v584_v56  ;;  %v348_v36 = vor.u32 1.1754944e-38, %v347_v20 }
  0x4d   :  { %v426_v54 = vpop.eup %425  ;;  %v270_v12 = vrot.slane %v269_v4, 2  ;;  %v265_v23 = vrot.slane %v264_v16, 1  ;;  %v305_v38 = vadd.f32 %v304_v24, %v303_v13  ;;  %v417_v40 = vadd.f32 -1.0, %v302_v18 }
  0x4e   :  { %v428_v6 = vpop.eup %427  ;;  %v322_v8 = vmul.f32 %v426_v54, %v582_v55  ;;  %vm327_vm10 = vweird.f32 %v426_v54  ;;  %vm331_vm15 = vcmp.eq.f32.partialorder %v330_v10, 8.507059e+37  ;;  %vm346_vm1 = vcmp.eq.f32.partialorder %v345_v26, 8.507059e+37 }
  0x4f   :  { %v337_v11 = vmul.f32 %v428_v6, %v584_v56  ;;  %v271_v21 = vadd.f32 %v270_v12, %v269_v4  ;;  %vm342_vm11 = vweird.f32 %v428_v6  ;;  %v266_v30 = vadd.f32 %v265_v23, %v264_v16  ;;  %vm328_vm12 = vmor %vm326_vm9, %vm327_vm10 }
  0x50   :  { %v323_v14 = vsub.f32 1.0, %v322_v8  ;;  %vm343_vm14 = vmor %vm341_vm13, %vm342_vm11  ;;  %v313_v44 = vrot.slane %v312_v31, 2  ;;  %v416_v45 = vadd.f32 -1.0, %v295_v28  ;;  %v306_v48 = vrot.slane %v305_v38, 2 }
  0x51   :  { %v338_v19 = vsub.f32 1.0, %v337_v11  ;;  %v272_v27 = vrot.slane %v271_v21, 1  ;;  %429 = vrcp.f32 %v266_v30  ;;  %vm356_vm2 = vweird.f32 %v266_v30 }
  0x52   :  { %v324_v22 = vmul.f32 %v426_v54, %v323_v14  ;;  %v314_v56 = vadd.f32 %v313_v44, %v312_v31  ;;  %v307_v60 = vadd.f32 %v306_v48, %v305_v38  ;;  %v360_v49 = vand.u32 2147483647, %v266_v30 }
  0x53   :  { %v339_v25 = vmul.f32 %v428_v6, %v338_v19  ;;  %v273_v34 = vadd.f32 %v272_v27, %v271_v21 }
  0x54   :  { %v325_v29 = vadd.f32 %v426_v54, %v324_v22  ;;  %v315_v63 = vrot.slane %v314_v56, 1  ;;  %v308_v2 = vrot.slane %v307_v60, 1  ;;  %vm361_vm8 = vcmp.eq.f32.partialorder %v360_v49, 8.507059e+37 }
  0x55   :  { %v340_v33 = vadd.f32 %v428_v6, %v339_v25  ;;  %431 = vrcp.f32 %v273_v34  ;;  %v377_v3 = vand.u32 2147483648, %v273_v34  ;;  %vm371_vm6 = vweird.f32 %v273_v34 }
  0x56   :  { %v329_v35 = vsel %vm328_vm12, %v426_v54, %v325_v29  ;;  %v362_v54 = vand.u32 2147483648, %v266_v30  ;;  %v316_v4 = vadd.f32 %v315_v63, %v314_v56 }
  0x57   :  { %v344_v41 = vsel %vm343_vm14, %v428_v6, %v340_v33  ;;  %v334_v42 = vsel %vm331_vm15, %v333_v32, %v329_v35  ;;  %v430_v55 = vpop.eup %429  ;;  %v309_v6 = vadd.f32 %v308_v2, %v307_v60  ;;  %v378_v10 = vor.u32 1.1754944e-38, %v377_v3 }
  0x58   :  { %v349_v43 = vsel %vm346_vm1, %v348_v36, %v344_v41  ;;  %v335_v50 = vmul.f32 %v416_v45, %v334_v42  ;;  %v352_v58 = vmul.f32 %v430_v55, %v266_v30  ;;  %vm357_vm3 = vweird.f32 %v430_v55 }
  0x59   :  { %v350_v46 = vmul.f32 %v417_v40, %v349_v43  ;;  %vm358_vm5 = vmor %vm356_vm2, %vm357_vm3  ;;  %v363_v9 = vor.u32 1.1754944e-38, %v362_v54  ;;  %v419_v11 = vadd.f32 -1.0, %v316_v4  ;;  %v418_v15 = vadd.f32 -1.0, %v309_v6 }
  0x5a   :  { %v353_v61 = vsub.f32 1.0, %v352_v58 }
  0x5b   :  { %v385_v51 = vrot.slane %v350_v46, 4  ;;  %v432_v52 = vpop.eup %431 }
  0x5c   :  { %v367_v0 = vmul.f32 %v432_v52, %v273_v34  ;;  %v354_v1 = vmul.f32 %v430_v55, %v353_v61  ;;  %vm372_vm4 = vweird.f32 %v432_v52 }
  0x5d   :  { %v387_v57 = vsel %vm40_vm0, %v335_v50, %v385_v51  ;;  %vm373_vm7 = vmor %vm371_vm6, %vm372_vm4 }
  0x5e   :  { %v391_v59 = vsub.f32 %v511_v37, %v387_v57  ;;  %v368_v47 = vsub.f32 1.0, %v367_v0  ;;  %v355_v53 = vadd.f32 %v430_v55, %v354_v1  ;;  %v375_v37 = vand.u32 2147483647, %v273_v34 }
  0x60   :  { %v393_v62 = vmax.f32 %v391_v59, 0.0  ;;  %v369_v5 = vmul.f32 %v432_v52, %v368_v47  ;;  %v359_v7 = vsel %vm358_vm5, %v430_v55, %v355_v53  ;;  %vm376_vm9 = vcmp.eq.f32.partialorder %v375_v37, 8.507059e+37 }
  0x61   :  { %v364_v13 = vsel %vm361_vm8, %v363_v9, %v359_v7 }
  0x62   :  { %395 = vst [vmem:[#allocation5] sm:$0xff] %v393_v62  ;;  %v370_v8 = vadd.f32 %v432_v52, %v369_v5  ;;  %v365_v17 = vmul.f32 %v418_v15, %v364_v13 }
  0x64   :  { %v374_v12 = vsel %vm373_vm7, %v432_v52, %v370_v8 }
  0x65   :  { %v379_v14 = vsel %vm376_vm9, %v378_v10, %v374_v12 }
  0x66   :  { %v380_v16 = vmul.f32 %v419_v11, %v379_v14 }
  0x68   :  { %v386_v18 = vrot.slane %v380_v16, 4 }
  0x6a   :  { %v388_v19 = vsel %vm40_vm0, %v365_v17, %v386_v18 }
  0x6b   :  { %v392_v20 = vsub.f32 %v515_v39, %v388_v19 }
  0x6d   :  { %v394_v21 = vmax.f32 %v392_v20, 0.0 }
  0x6f   :  { %396 = vst [vmem:[#allocation5 + $0x8] sm:$0xff] %v394_v21 }
  0x70   :  { %409 = dma.vmem_to_hbm [thread:$0]  %s402_s13, 256, %s404_s16, [#allocation4], %s486_s11, %s486_s11, %s487_s12  }
  0x71   :  { %483 = dma.done.wait [#allocation4], 256  }
  0x72   :  { %484 = vsyncadd [#allocation4], 4294967040 }
  0x73   :  { %414 = vsyncpa [#allocation3], 1 }
  0x74   :  { %415 = vsyncpa [#allocation4], 1 }

</bundles_post_ra>
